<compile_context>
chip_gen: v7x
topology: tpu7x:2x2x1
jax: 0.10.0
libtpu: 0.0.40
codegen_flags: <defaults>
</compile_context>

<pallas_src>
import math

import jax
import jax.numpy as jnp
from jax.experimental import pallas as pl
from jax.experimental.pallas import tpu as pltpu


def _normalize_kernel(x_ref, mean_ref, inv_std_ref, o_ref):
    # x_ref/o_ref: (TR, L); mean_ref/inv_std_ref: (1, L) -> broadcast over rows.
    o_ref[...] = (x_ref[...] - mean_ref[...]) * inv_std_ref[...]


def _round_up(x, m):
    return ((x + m - 1) // m) * m


def preprocess_normalization(x, means, stds, *, target_lane=1024, target_rows=512):
    """(x - means) / stds with means/stds broadcast along the last (channel) axis.

    Semantics match PyTorch PreprocesNormalization.forward for x: (B, H, W, C).
    """
    B, H, W, C = x.shape
    orig_dtype = x.dtype
    N = B * H * W * C

    # Lane-dense layout: L is a multiple of both 128 (full-lane, unmasked vst)
    # and C (so every row starts on a channel boundary and the tiled
    # mean/std pattern is identical for all rows).
    base = (C * 128) // math.gcd(C, 128)          # lcm(C, 128)
    L = base * max(1, target_lane // base)

    n_rows = pl.cdiv(N, L)
    # Row-tile: always a multiple of 8 (sublane rule). ~TR*L*4 B per block
    # (<= 2 MiB): 2x-buffered input + output stays well under the scoped VMEM
    # limit on v5e/v6e and on v7x's 64 MiB VMEM.
    tr = min(target_rows, _round_up(n_rows, 8))
    rows_padded = _round_up(n_rows, tr)
    n_padded = rows_padded * L

    x_flat = x.reshape(-1).astype(jnp.float32)
    if n_padded != N:
        x_flat = jnp.pad(x_flat, (0, n_padded - N))
    x2d = x_flat.reshape(rows_padded, L)

    # Tiny per-channel parameter prep done once in the wrapper:
    # precompute the reciprocal so the kernel only does sub + mul (no EUP divide).
    means_f = jnp.asarray(means, dtype=jnp.float32).reshape(-1)
    stds_f = jnp.asarray(stds, dtype=jnp.float32).reshape(-1)
    mean_row = jnp.tile(means_f, L // C).reshape(1, L)
    inv_std_row = jnp.tile(1.0 / stds_f, L // C).reshape(1, L)

    grid = (rows_padded // tr,)

    out2d = pl.pallas_call(
        _normalize_kernel,
        out_shape=jax.ShapeDtypeStruct((rows_padded, L), jnp.float32),
        grid_spec=pltpu.PrefetchScalarGridSpec(
            num_scalar_prefetch=0,
            grid=grid,
            in_specs=[
                pl.BlockSpec((tr, L), lambda i: (i, 0)),   # x tile (lane-dense)
                pl.BlockSpec((1, L), lambda i: (0, 0)),    # tiled means (resident)
                pl.BlockSpec((1, L), lambda i: (0, 0)),    # tiled 1/std (resident)
            ],
            out_specs=pl.BlockSpec((tr, L), lambda i: (i, 0)),
        ),
        compiler_params=pltpu.CompilerParams(
            # Single axis; 'parallel' shards the row-tile loop across v7x's 2 TCs.
            dimension_semantics=("parallel",),
        ),
    )(x2d, mean_row, inv_std_row)

    out = out2d.reshape(-1)[:N].reshape(B, H, W, C)
    return out.astype(orig_dtype)


if __name__ == "__main__":
    key = jax.random.PRNGKey(0)
    B, H, W, C = 2, 16, 16, 4

    kx, _ = jax.random.split(key)
    x = jax.random.normal(kx, (B, H, W, C), dtype=jnp.float32) * 3.0 + 1.5

    # Deterministic "parameters" (module __init__ takes means/stds of length C).
    means = jnp.array([0.1, -0.2, 0.3, 0.4], dtype=jnp.float32)
    stds = jnp.array([1.5, 0.5, 2.0, 0.25], dtype=jnp.float32)

    out = preprocess_normalization(x, means, stds)
    out = jax.block_until_ready(out)

    # Reference: exact module semantics (divide). Kernel uses a precomputed
    # reciprocal, so allow ~1-2 ulp of deviation.
    ref = (x - means.reshape(1, 1, 1, -1)) / stds.reshape(1, 1, 1, -1)
    assert out.shape == x.shape
    assert jnp.allclose(out, ref, atol=1e-5, rtol=1e-5)

    print("KERNEL_OK")
</pallas_src>

<mosaic_0001>
module attributes {stable_mosaic.version = 11 : i64} {
  func.func @_normalize_kernel(%arg0: i32, %arg1: memref<8x1024xf32, #tpu.memory_space<vmem>>, %arg2: memref<1x1024xf32, #tpu.memory_space<vmem>>, %arg3: memref<1x1024xf32, #tpu.memory_space<vmem>>, %arg4: memref<8x1024xf32, #tpu.memory_space<vmem>>) attributes {dimension_semantics = [#tpu.dimension_semantics<parallel>], iteration_bounds = array<i64: 1>, scalar_prefetch = 0 : i64, scratch_operands = 0 : i64, tpu.core_type = #tpu.core_type<tc>, window_params = [{transform_indices = @transform_0, window_bounds = array<i64: 8, 1024>}, {pipeline_mode = #tpu.pipeline_mode<synchronous>, transform_indices = @transform_1, window_bounds = array<i64: 1, 1024>}, {pipeline_mode = #tpu.pipeline_mode<synchronous>, transform_indices = @transform_2, window_bounds = array<i64: 1, 1024>}, {transform_indices = @transform_3, window_bounds = array<i64: 8, 1024>}]} {
    %c0 = arith.constant 0 : index
    %c0_0 = arith.constant 0 : index
    %0 = vector.load %arg1[%c0, %c0_0] : memref<8x1024xf32, #tpu.memory_space<vmem>>, vector<8x1024xf32>
    %c0_1 = arith.constant 0 : index
    %c0_2 = arith.constant 0 : index
    %1 = vector.load %arg2[%c0_1, %c0_2] : memref<1x1024xf32, #tpu.memory_space<vmem>>, vector<1x1024xf32>
    %2 = vector.broadcast %1 : vector<1x1024xf32> to vector<8x1024xf32>
    %3 = arith.subf %0, %2 : vector<8x1024xf32>
    %c0_3 = arith.constant 0 : index
    %c0_4 = arith.constant 0 : index
    %4 = vector.load %arg3[%c0_3, %c0_4] : memref<1x1024xf32, #tpu.memory_space<vmem>>, vector<1x1024xf32>
    %5 = vector.broadcast %4 : vector<1x1024xf32> to vector<8x1024xf32>
    %6 = arith.mulf %3, %5 : vector<8x1024xf32>
    %c0_5 = arith.constant 0 : index
    %c0_6 = arith.constant 0 : index
    %7 = vector.load %arg4[%c0_5, %c0_6] : memref<8x1024xf32, #tpu.memory_space<vmem>>, vector<8x1024xf32>
    tpu.vector_store %arg4[%c0_5, %c0_6], %6 {strides = array<i32>} : memref<8x1024xf32, #tpu.memory_space<vmem>>, vector<8x1024xf32>,
    return
  }
  func.func @transform_0(%arg0: i32) -> (i32, i32) {
    %c0_i32 = arith.constant 0 : i32
    %c0_i32_0 = arith.constant 0 : i32
    return %arg0, %c0_i32 : i32, i32
  }
  func.func @transform_1(%arg0: i32) -> (i32, i32) {
    %c0_i32 = arith.constant 0 : i32
    %c0_i32_0 = arith.constant 0 : i32
    %c0_i32_1 = arith.constant 0 : i32
    return %c0_i32, %c0_i32_0 : i32, i32
  }
  func.func @transform_2(%arg0: i32) -> (i32, i32) {
    %c0_i32 = arith.constant 0 : i32
    %c0_i32_0 = arith.constant 0 : i32
    %c0_i32_1 = arith.constant 0 : i32
    return %c0_i32, %c0_i32_0 : i32, i32
  }
  func.func @transform_3(%arg0: i32) -> (i32, i32) {
    %c0_i32 = arith.constant 0 : i32
    %c0_i32_0 = arith.constant 0 : i32
    return %arg0, %c0_i32 : i32, i32
  }
}

</mosaic_0001>

<bundles_post_ra>
// kernel: tpu_custom_call.1
= control target key start
LH: loop header
LB: loop body
LE: loop exit
PB: predicated region body
PF: predicated region fallthrough
CT: control target
= control target key end

     0   :  { %8 = vsyncpa [#allocation3], 0  ;;  %s352_s0 = inlined_call_operand.hbm [shape: f32[8,1024], index: 0, kind: input, shape index: {}]   ;;  %s353_s1 = inlined_call_operand.hbm [shape: f32[1,1024], index: 1, kind: input, shape index: {}]   ;;  %s354_s2 = inlined_call_operand.hbm [shape: f32[1,1024], index: 2, kind: input, shape index: {}]   ;;  %s355_s3 = inlined_call_operand.hbm [shape: f32[8,1024], index: 3, kind: output, shape index: {}]  }
   0x1   :  { %9 = vsyncpa [#allocation6], 0 }
   0x2   :  { %10 = vsyncpa [#allocation4], 0  ;;  %s280_s12 = smov [#allocation5]   ;;  %s281_s14 = smov [#allocation2]  }
   0x3   :  { %s27_s13 = sshll.u32 %s280_s12, 4  ;;  %s17_s15 = sshll.u32 %s281_s14, 4  ;;  %s28_s13 = int_to_ptr.vmem [resolvable:$true] %s27_s13  ;;  %s18_s15 = int_to_ptr.vmem [resolvable:$true] %s17_s15 }
   0x4   :  { %s186_s18 = scalar_lea.hbm %s353_s1, 128 }
   0x5   :  { %p187_p0 = scmp.ne.s32.totalorder %s353_s1, %s186_s18  ;;  %p190_p1 = scmp.lt.u32.totalorder %s186_s18, %s353_s1 }
   0x7   :  { %p192_p2 = pnand %p190_p1, %p187_p0 }
   0x9   :  { %195 = shalt.err (!%p192_p2)
}
   0xa   :  { %s196_s23 = scalar_lea.vmem %s28_s13, 128  ;;  %p201_p4 = scmp.lt.s32.totalorder %s28_s13, %s28_s13 }
   0xb   :  { %p197_p3 = scmp.ne.s32.totalorder %s28_s13, %s196_s23  ;;  %p202_p5 = scmp.lt.s32.totalorder %s196_s23, %s196_s23 }
   0xd   :  { %p203_p6 = por %p202_p5, %p201_p4 }
   0xf   :  { %p204_p7 = pnand %p203_p6, %p197_p3 }
  0x11   :  { %207 = shalt.err (!%p204_p7)
}
  0x12   :  { %30 = dma.hbm_to_vmem [thread:$0]  %s353_s1, 128, %s28_s13, [#allocation6]  }
  0x13   :  { %s208_s28 = scalar_lea.hbm %s352_s0, 1024 }
  0x14   :  { %p209_p8 = scmp.ne.s32.totalorder %s352_s0, %s208_s28  ;;  %p212_p9 = scmp.lt.u32.totalorder %s208_s28, %s352_s0 }
  0x16   :  { %p214_p10 = pnand %p212_p9, %p209_p8 }
  0x18   :  { %217 = shalt.err (!%p214_p10)
}
  0x19   :  { %s218_s6 = scalar_lea.vmem %s18_s15, 1024  ;;  %p223_p12 = scmp.lt.s32.totalorder %s18_s15, %s18_s15 }
  0x1a   :  { %p219_p11 = scmp.ne.s32.totalorder %s18_s15, %s218_s6  ;;  %p224_p13 = scmp.lt.s32.totalorder %s218_s6, %s218_s6 }
  0x1c   :  { %p225_p0 = por %p224_p13, %p223_p12 }
  0x1e   :  { %p226_p1 = pnand %p225_p0, %p219_p11 }
  0x20   :  { %229 = shalt.err (!%p226_p1)
}
  0x21   :  { %20 = dma.hbm_to_vmem [thread:$0]  %s352_s0, 1024, %s18_s15, [#allocation3]  }
  0x22   :  { %s282_s8 = smov [#allocation7]   ;;  %s230_s12 = scalar_lea.hbm %s354_s2, 128 }
  0x23   :  { %s37_s9 = sshll.u32 %s282_s8, 4  ;;  %p231_p2 = scmp.ne.s32.totalorder %s354_s2, %s230_s12  ;;  %s38_s9 = int_to_ptr.vmem [resolvable:$true] %s37_s9 }
  0x24   :  { %p234_p3 = scmp.lt.u32.totalorder %s230_s12, %s354_s2 }
  0x26   :  { %p236_p4 = pnand %p234_p3, %p231_p2 }
  0x28   :  { %239 = shalt.err (!%p236_p4)
}
  0x29   :  { %s240_s18 = scalar_lea.vmem %s38_s9, 128  ;;  %p245_p6 = scmp.lt.s32.totalorder %s38_s9, %s38_s9 }
  0x2a   :  { %p241_p5 = scmp.ne.s32.totalorder %s38_s9, %s240_s18  ;;  %p246_p7 = scmp.lt.s32.totalorder %s240_s18, %s240_s18 }
  0x2c   :  { %p247_p8 = por %p246_p7, %p245_p6 }
  0x2e   :  { %p248_p9 = pnand %p247_p8, %p241_p5 }
  0x30   :  { %251 = shalt.err (!%p248_p9)
}
  0x31   :  { %40 = dma.hbm_to_vmem [thread:$0]  %s354_s2, 128, %s38_s9, [#allocation6]  }
  0x32   :  { %274 = dma.done.wait [#allocation3], 1024  }
  0x33   :  { %275 = vsyncadd [#allocation3], 4294966272 }
  0x34   :  { %276 = dma.done.wait [#allocation6], 256  }
  0x35   :  { %277 = vsyncadd [#allocation6], 4294967040  ;;  %v60_v0 = vlaneseq  ;;  %v50_v7 = vld [vmem:[#allocation2] sm:$0xff]  ;;  %v108_v9 = vld [vmem:[#allocation7] sm:$0xff]  ;;  %s283_s2 = smov [#allocation8]  }
  0x36   :  { %v58_v8 = vld [vmem:[#allocation5] sm:$0xff]  ;;  %v51_v15 = vld [vmem:[#allocation2 + $0x8] sm:$0xff]  ;;  %v52_v18 = vld [vmem:[#allocation2 + $0x10] sm:$0xff]  ;;  %s172_s19 = sshll.u32 %s283_s2, 4  ;;  %s173_s19 = int_to_ptr.vmem [resolvable:$true] %s172_s19 }
  0x37   :  { %v61_v1 = vshrl.u32 %v60_v0, 7  ;;  %v53_v19 = vld [vmem:[#allocation2 + $0x18] sm:$0xff]  ;;  %v54_v24 = vld [vmem:[#allocation2 + $0x20] sm:$0xff]  ;;  %v55_v29 = vld [vmem:[#allocation2 + $0x28] sm:$0xff]  ;;  %s252_s20 = scalar_lea.vmem %s173_s19, 1024  ;;  %p257_p11 = scmp.lt.s32.totalorder %s173_s19, %s173_s19 }
  0x38   :  { %v56_v34 = vld [vmem:[#allocation2 + $0x30] sm:$0xff]  ;;  %v57_v43 = vld [vmem:[#allocation2 + $0x38] sm:$0xff]  ;;  %p253_p10 = scmp.ne.s32.totalorder %s173_s19, %s252_s20  ;;  %p258_p12 = scmp.lt.s32.totalorder %s252_s20, %s252_s20 }
  0x39   :  { %v62_v2 = vsub.s32 0, %v61_v1  ;;  %v66_v3 = vsub.s32 1, %v61_v1  ;;  %v70_v4 = vsub.s32 2, %v61_v1  ;;  %v74_v5 = vsub.s32 3, %v61_v1 }
  0x3a   :  { %v78_v6 = vsub.s32 4, %v61_v1  ;;  %v82_v10 = vsub.s32 5, %v61_v1  ;;  %v86_v11 = vsub.s32 6, %v61_v1  ;;  %v90_v12 = vsub.s32 7, %v61_v1  ;;  %p259_p13 = por %p258_p12, %p257_p11 }
  0x3b   :  { %v63_v13 = vrot.slane %v58_v8, %v62_v2  ;;  %v113_v14 = vrot.slane %v108_v9, %v62_v2  ;;  %v67_v16 = vrot.slane %v58_v8, %v66_v3  ;;  %v117_v17 = vrot.slane %v108_v9, %v66_v3 }
  0x3c   :  { %v71_v20 = vrot.slane %v58_v8, %v70_v4  ;;  %v121_v21 = vrot.slane %v108_v9, %v70_v4  ;;  %v75_v22 = vrot.slane %v58_v8, %v74_v5  ;;  %v125_v23 = vrot.slane %v108_v9, %v74_v5  ;;  %p260_p0 = pnand %p259_p13, %p253_p10 }
  0x3d   :  { %v100_v25 = vsub.f32 %v50_v7, %v63_v13  ;;  %v101_v26 = vsub.f32 %v51_v15, %v67_v16  ;;  %v79_v27 = vrot.slane %v58_v8, %v78_v6  ;;  %v129_v28 = vrot.slane %v108_v9, %v78_v6 }
  0x3e   :  { %v102_v30 = vsub.f32 %v52_v18, %v71_v20  ;;  %v103_v31 = vsub.f32 %v53_v19, %v75_v22  ;;  %v83_v32 = vrot.slane %v58_v8, %v82_v10  ;;  %v133_v33 = vrot.slane %v108_v9, %v82_v10 }
  0x3f   :  { %v150_v35 = vmul.f32 %v113_v14, %v100_v25  ;;  %v151_v36 = vmul.f32 %v117_v17, %v101_v26  ;;  %v104_v37 = vsub.f32 %v54_v24, %v79_v27  ;;  %v87_v38 = vrot.slane %v58_v8, %v86_v11 }
  0x40   :  { %v152_v39 = vmul.f32 %v121_v21, %v102_v30  ;;  %v153_v40 = vmul.f32 %v125_v23, %v103_v31  ;;  %v105_v41 = vsub.f32 %v55_v29, %v83_v32  ;;  %v137_v42 = vrot.slane %v108_v9, %v86_v11 }
  0x41   :  { %158 = vst [vmem:[#allocation8] sm:$0xff] %v150_v35  ;;  %159 = vst [vmem:[#allocation8 + $0x8] sm:$0xff] %v151_v36  ;;  %v154_v44 = vmul.f32 %v129_v28, %v104_v37  ;;  %v106_v45 = vsub.f32 %v56_v34, %v87_v38  ;;  %v91_v46 = vrot.slane %v58_v8, %v90_v12 }
  0x42   :  { %v141_v47 = vrot.slane %v108_v9, %v90_v12  ;;  %160 = vst [vmem:[#allocation8 + $0x10] sm:$0xff] %v152_v39  ;;  %161 = vst [vmem:[#allocation8 + $0x18] sm:$0xff] %v153_v40  ;;  %v155_v48 = vmul.f32 %v133_v33, %v105_v41 }
  0x43   :  { %162 = vst [vmem:[#allocation8 + $0x20] sm:$0xff] %v154_v44  ;;  %v156_v49 = vmul.f32 %v137_v42, %v106_v45  ;;  %v107_v50 = vsub.f32 %v57_v43, %v91_v46 }
  0x44   :  { %163 = vst [vmem:[#allocation8 + $0x28] sm:$0xff] %v155_v48 }
  0x45   :  { %164 = vst [vmem:[#allocation8 + $0x30] sm:$0xff] %v156_v49  ;;  %v157_v51 = vmul.f32 %v141_v47, %v107_v50 }
  0x47   :  { %165 = vst [vmem:[#allocation8 + $0x38] sm:$0xff] %v157_v51 }
  0x48   :  { %263 = shalt.err (!%p260_p0)
}
  0x49   :  { %s264_s23 = scalar_lea.hbm %s355_s3, 1024 }
  0x4a   :  { %p265_p1 = scmp.ne.s32.totalorder %s355_s3, %s264_s23  ;;  %p268_p2 = scmp.lt.u32.totalorder %s264_s23, %s355_s3 }
  0x4c   :  { %p270_p3 = pnand %p268_p2, %p265_p1 }
  0x4e   :  { %273 = shalt.err (!%p270_p3)
}
  0x4f   :  { %175 = dma.vmem_to_hbm [thread:$0]  %s173_s19, 1024, %s355_s3, [#allocation4]  }
  0x50   :  { %278 = dma.done.wait [#allocation4], 1024  }
  0x51   :  { %279 = vsyncadd [#allocation4], 4294966272 }
  0x52   :  { %179 = vsyncpa [#allocation3], 1 }
  0x53   :  { %180 = vsyncpa [#allocation6], 1 }
  0x54   :  { %181 = vsyncpa [#allocation4], 1 }

</bundles_post_ra>
